<compile_context>
chip_gen: v6e
topology: v6e:2x2x1
jax: 0.10.0
libtpu: 0.0.40
codegen_flags: <defaults>
</compile_context>

<pallas_src>
import jax
import jax.numpy as jnp
from jax import lax
from jax.experimental import pallas as pl
from jax.experimental.pallas import tpu as pltpu

_VMEM_LIMIT = 32 * 1024 * 1024       # scoped-VMEM limit safe on v5e/v6e/v7x
_FUSE_VMEM_BYTES = 16 * 1024 * 1024  # max loss bytes for the VMEM-resident search


# ---------------------------------------------------------------------------
# Kernel 1: per-pixel cross-entropy
#   loss[n] = logsumexp(x[:, n]) - x[target[n], n]
# Block layout: logits (1, C, TILE_N)  [classes on sublanes, pixels on lanes].
# pred stays NCHW (free (B, C, H*W) view, native dtype); upcast happens here.
# TODO(synk): targets are assumed in [0, C); an ignore_index (e.g. 255) is not
# supported by this criterion and would diverge from a masked PyTorch CE.
# ---------------------------------------------------------------------------
def ce_kernel(logits_ref, target_ref, loss_ref):
    x = logits_ref[0].astype(jnp.float32)              # (C, TILE_N)
    tgt = target_ref[0]                                 # (1, TILE_N) int32

    m = jnp.max(x, axis=0, keepdims=True)               # (1, TILE_N) sublane reduce
    lse = m + jnp.log(jnp.sum(jnp.exp(x - m), axis=0, keepdims=True))

    cls = lax.broadcasted_iota(jnp.int32, x.shape, 0)   # (C, TILE_N)
    picked = jnp.sum(jnp.where(cls == tgt, x, 0.0), axis=0, keepdims=True)

    loss_ref[0] = lse - picked                           # (1, TILE_N) lane-dense store


# ---------------------------------------------------------------------------
# Kernel 2: fused exact threshold search + bootstrapped mean.
# The whole loss slab lives in VMEM; a 1+31 step bisection on the monotone
# int32 key ordering of f32 finds TK = num-th largest loss EXACTLY, carrying
# the masked (sum, count) snapshot of the current lower bound so no extra
# reduction pass is needed.  Output: the mean, as a (1,) SMEM scalar.
# ---------------------------------------------------------------------------
def _make_select_kernel(num):
    def select_kernel(loss_ref, out_ref):
        def count_sum(thr):
            x = loss_ref[...]                            # re-read from VMEM
            bits = pltpu.bitcast(x, jnp.int32)
            # monotone int32 key: key(b) = b  (b >= 0),  b ^ 0x7FFFFFFF  (b < 0)
            key = jnp.where(bits >= 0, bits, bits ^ jnp.int32(0x7FFFFFFF))
            mask = key >= thr
            # float32 count is exact here: the fused path is gated to
            # N <= 4M (< 2^24) elements.
            cnt = jnp.sum(mask.astype(jnp.float32))
            s = jnp.sum(jnp.where(mask, x, 0.0))
            return cnt, s

        # First split decides the sign half so |hi - lo| always fits in int32.
        cnt0, sum0 = count_sum(jnp.int32(0))
        ge0 = cnt0 >= num
        lo = jnp.where(ge0, jnp.int32(0), jnp.int32(-2147483647))
        hi = jnp.where(ge0, jnp.int32(2147483647), jnp.int32(0))
        bs = jnp.where(ge0, sum0, jnp.float32(0.0))
        bc = jnp.where(ge0, cnt0, jnp.float32(1.0))

        def body(_, carry):
            lo, hi, bs, bc = carry
            mid = lo + (hi - lo) // 2
            cnt, s = count_sum(mid)
            take = cnt >= num
            lo = jnp.where(take, mid, lo)
            hi = jnp.where(take, hi, mid)
            bs = jnp.where(take, s, bs)
            bc = jnp.where(take, cnt, bc)
            return lo, hi, bs, bc

        lo, hi, bs, bc = lax.fori_loop(0, 31, body, (lo, hi, bs, bc))
        out_ref[0] = bs / bc

    return select_kernel


# ---------------------------------------------------------------------------
# Plain-JAX fallback of the same exact bisection, for loss slabs too large to
# hold in VMEM (~32 fused compare+reduce passes; still far cheaper than top_k).
# ---------------------------------------------------------------------------
def _select_mean_jax(loss, num):
    bits = lax.bitcast_convert_type(loss, jnp.int32)
    key = jnp.where(bits >= 0, bits, bits ^ jnp.int32(0x7FFFFFFF))

    def count_sum(thr):
        mask = key >= thr
        return (jnp.sum(mask.astype(jnp.int32)),
                jnp.sum(jnp.where(mask, loss, 0.0)))

    cnt0, sum0 = count_sum(jnp.int32(0))
    ge0 = cnt0 >= num
    lo = jnp.where(ge0, jnp.int32(0), jnp.int32(-2147483647))
    hi = jnp.where(ge0, jnp.int32(2147483647), jnp.int32(0))
    bs = jnp.where(ge0, sum0, jnp.float32(0.0))
    bc = jnp.where(ge0, cnt0, jnp.int32(1))

    def body(_, carry):
        lo, hi, bs, bc = carry
        mid = lo + (hi - lo) // 2
        cnt, s = count_sum(mid)
        take = cnt >= num
        return (jnp.where(take, mid, lo), jnp.where(take, hi, mid),
                jnp.where(take, s, bs), jnp.where(take, cnt, bc))

    _, _, bs, bc = lax.fori_loop(0, 31, body, (lo, hi, bs, bc))
    return bs / bc.astype(jnp.float32)


# ---------------------------------------------------------------------------
# Tiling helper: ~10 MiB per-block byte budget (<= ~20 MiB double-buffered),
# capped so the grid keeps >= ~8 total steps; always a multiple of 128 lanes.
# ---------------------------------------------------------------------------
def _pick_tile_n(HW, per_px_bytes, B):
    budget_px = max(128, (10 << 20) // max(per_px_bytes, 1))
    min_blocks = max(1, -(-8 // max(B, 1)))          # ceil(8 / B) target steps
    want_px = max(128, -(-HW // min_blocks))         # ceil(HW / min_blocks)
    tile = min(budget_px, want_px)
    return max(128, (tile // 128) * 128)


# ---------------------------------------------------------------------------
# Wrapper: reproduces BootstrappedCrossEntropy.forward(pred, target, step)
# ---------------------------------------------------------------------------
def bootstrapped_ce(pred, target, step, K=0.15, momentum=0.99998):
    B, C, H, W = pred.shape
    HW = H * W
    N = B * HW
    # TODO(synk): `step` must be a static Python int (as in the PyTorch module);
    # a traced step would break the int() cast below.
    num = int(K * B * H * W * max(momentum ** step, K))
    num = max(1, min(num, N))                         # guard num==0 / num>N

    # NCHW -> (B, C, HW) is a free view; pred stays in its native dtype.
    logits3 = pred.reshape(B, C, HW)
    target3 = target.reshape(B, 1, HW)
    if target3.dtype != jnp.int32:
        target3 = target3.astype(jnp.int32)

    per_px_bytes = C * pred.dtype.itemsize + 4 + 4    # logits + target + loss
    TILE_N = _pick_tile_n(HW, per_px_bytes, B)
    grid_n = pl.cdiv(HW, TILE_N)                      # boundary block is masked

    loss3 = pl.pallas_call(
        ce_kernel,
        out_shape=jax.ShapeDtypeStruct((B, 1, HW), jnp.float32),
        grid=(B, grid_n),
        in_specs=[pl.BlockSpec((1, C, TILE_N), lambda b, n: (b, 0, n)),
                  pl.BlockSpec((1, 1, TILE_N), lambda b, n: (b, 0, n))],
        out_specs=pl.BlockSpec((1, 1, TILE_N), lambda b, n: (b, 0, n)),
        compiler_params=pltpu.CompilerParams(
            dimension_semantics=("parallel", "parallel"),
            vmem_limit_bytes=_VMEM_LIMIT),
    )(logits3, target3)

    loss2 = loss3.reshape(B, HW)                      # free squeeze

    if N * 4 <= _FUSE_VMEM_BYTES:
        # Fused exact threshold search + masked mean, loss resident in VMEM.
        mean = pl.pallas_call(
            _make_select_kernel(num),
            out_shape=jax.ShapeDtypeStruct((1,), jnp.float32),
            in_specs=[pl.BlockSpec(memory_space=pltpu.MemorySpace.VMEM)],
            out_specs=pl.BlockSpec(memory_space=pltpu.MemorySpace.SMEM),
            compiler_params=pltpu.CompilerParams(vmem_limit_bytes=_VMEM_LIMIT),
        )(loss2)[0]
    else:
        # Loss slab too large for VMEM residency: same exact bisection in JAX.
        mean = _select_mean_jax(loss2, num)
    return mean


# ---------------------------------------------------------------------------
# Pure-JAX reference for verification
# ---------------------------------------------------------------------------
def ref_forward(pred, target, step, K=0.15, momentum=0.99998):
    B, C, H, W = pred.shape
    N = B * H * W
    num = int(K * B * H * W * max(momentum ** step, K))
    num = max(1, min(num, N))
    logits = jnp.transpose(pred, (0, 2, 3, 1)).reshape(-1, C).astype(jnp.float32)
    lse = jax.scipy.special.logsumexp(logits, axis=-1)
    picked = jnp.take_along_axis(logits, target.reshape(-1, 1), axis=-1)[:, 0]
    loss = lse - picked
    tk = jnp.sort(loss)[::-1][num - 1]
    mask = loss >= tk
    return jnp.sum(jnp.where(mask, loss, 0.0)) / jnp.sum(mask.astype(jnp.float32))


if __name__ == "__main__":
    key = jax.random.PRNGKey(0)
    B, C, H, W = 2, 4, 16, 16
    k1, k2 = jax.random.split(key)
    pred = jax.random.normal(k1, (B, C, H, W), dtype=jnp.float32)
    target = jax.random.randint(k2, (B, H, W), 0, C, dtype=jnp.int32)
    step = 100

    out = bootstrapped_ce(pred, target, step)
    out = jax.block_until_ready(out)

    ref = ref_forward(pred, target, step)
    assert jnp.allclose(out, ref, atol=1e-4, rtol=1e-4), (out, ref)
    print("KERNEL_OK")
</pallas_src>

<mosaic_0001>
module attributes {stable_mosaic.version = 11 : i64} {
  func.func @ce_kernel(%arg0: i32, %arg1: i32, %arg2: memref<1x4x128xf32, #tpu.memory_space<vmem>>, %arg3: memref<1x1x128xi32, #tpu.memory_space<vmem>>, %arg4: memref<1x1x128xf32, #tpu.memory_space<vmem>>) attributes {dimension_semantics = [#tpu.dimension_semantics<parallel>, #tpu.dimension_semantics<parallel>], iteration_bounds = array<i64: 2, 2>, scalar_prefetch = 0 : i64, scratch_operands = 0 : i64, tpu.core_type = #tpu.core_type<tc>, window_params = [{transform_indices = @transform_0, window_bounds = array<i64: 1, 4, 128>}, {transform_indices = @transform_1, window_bounds = array<i64: 1, 1, 128>}, {transform_indices = @transform_2, window_bounds = array<i64: 1, 1, 128>}]} {
    %c0 = arith.constant 0 : index
    %c0_0 = arith.constant 0 : index
    %c0_1 = arith.constant 0 : index
    %0 = vector.load %arg2[%c0, %c0_0, %c0_1] : memref<1x4x128xf32, #tpu.memory_space<vmem>>, vector<1x4x128xf32>
    %1 = vector.shape_cast %0 : vector<1x4x128xf32> to vector<4x128xf32>
    %c0_2 = arith.constant 0 : index
    %c0_3 = arith.constant 0 : index
    %c0_4 = arith.constant 0 : index
    %2 = vector.load %arg3[%c0_2, %c0_3, %c0_4] : memref<1x1x128xi32, #tpu.memory_space<vmem>>, vector<1x1x128xi32>
    %3 = vector.shape_cast %2 : vector<1x1x128xi32> to vector<1x128xi32>
    %cst = arith.constant dense<0xFF800000> : vector<128xf32>
    %4 = vector.multi_reduction <maximumf>, %1, %cst [0] : vector<4x128xf32> to vector<128xf32>
    %5 = vector.shape_cast %4 : vector<128xf32> to vector<1x128xf32>
    %6 = vector.broadcast %5 : vector<1x128xf32> to vector<4x128xf32>
    %7 = arith.subf %1, %6 : vector<4x128xf32>
    %8 = math.exp %7 : vector<4x128xf32>
    %cst_5 = arith.constant dense<0.000000e+00> : vector<128xf32>
    %9 = vector.multi_reduction <add>, %8, %cst_5 [0] : vector<4x128xf32> to vector<128xf32>
    %10 = vector.shape_cast %9 : vector<128xf32> to vector<1x128xf32>
    %11 = math.log %10 : vector<1x128xf32>
    %12 = arith.addf %5, %11 : vector<1x128xf32>
    %13 = tpu.iota {dimensions = array<i32: 0>} : vector<4x128xi32>
    %14 = vector.broadcast %3 : vector<1x128xi32> to vector<4x128xi32>
    %15 = arith.cmpi eq, %13, %14 : vector<4x128xi32>
    %cst_6 = arith.constant 0.000000e+00 : f32
    %16 = vector.broadcast %cst_6 : f32 to vector<4x128xf32>
    %17 = arith.select %15, %1, %16 : vector<4x128xi1>, vector<4x128xf32>
    %cst_7 = arith.constant dense<0.000000e+00> : vector<128xf32>
    %18 = vector.multi_reduction <add>, %17, %cst_7 [0] : vector<4x128xf32> to vector<128xf32>
    %19 = vector.shape_cast %18 : vector<128xf32> to vector<1x128xf32>
    %20 = arith.subf %12, %19 : vector<1x128xf32>
    %c0_8 = arith.constant 0 : index
    %c0_9 = arith.constant 0 : index
    %c0_10 = arith.constant 0 : index
    %21 = vector.load %arg4[%c0_8, %c0_9, %c0_10] : memref<1x1x128xf32, #tpu.memory_space<vmem>>, vector<1x1x128xf32>
    %22 = vector.shape_cast %21 : vector<1x1x128xf32> to vector<1x128xf32>
    %23 = vector.shape_cast %20 : vector<1x128xf32> to vector<1x1x128xf32>
    tpu.vector_store %arg4[%c0_8, %c0_9, %c0_10], %23 {strides = array<i32>} : memref<1x1x128xf32, #tpu.memory_space<vmem>>, vector<1x1x128xf32>,
    return
  }
  func.func @transform_0(%arg0: i32, %arg1: i32) -> (i32, i32, i32) {
    %c0_i32 = arith.constant 0 : i32
    %c0_i32_0 = arith.constant 0 : i32
    return %arg0, %c0_i32, %arg1 : i32, i32, i32
  }
  func.func @transform_1(%arg0: i32, %arg1: i32) -> (i32, i32, i32) {
    %c0_i32 = arith.constant 0 : i32
    %c0_i32_0 = arith.constant 0 : i32
    return %arg0, %c0_i32, %arg1 : i32, i32, i32
  }
  func.func @transform_2(%arg0: i32, %arg1: i32) -> (i32, i32, i32) {
    %c0_i32 = arith.constant 0 : i32
    %c0_i32_0 = arith.constant 0 : i32
    return %arg0, %c0_i32, %arg1 : i32, i32, i32
  }
}

</mosaic_0001>

<bundles_post_ra>
// kernel: tpu_custom_call.1
= control target key start
LH: loop header
LB: loop body
LE: loop exit
PB: predicated region body
PF: predicated region fallthrough
CT: control target
= control target key end

     0   :  { %s844_s0 = inlined_call_operand.hbm [shape: f32[2,4,256], index: 0, kind: input, shape index: {}]   ;;  %s845_s1 = inlined_call_operand.hbm [shape: s32[2,1,256], index: 1, kind: input, shape index: {}]   ;;  %s846_s2 = inlined_call_operand.hbm [shape: f32[2,1,256], index: 2, kind: output, shape index: {}]  }
   0x1   :  { %847 = sst [smem:[#allocation11_spill]] %s844_s0 }
   0x2   :  { %7 = vsyncpa [#allocation3], 0 }
   0x3   :  { %9 = vsyncpa [#allocation3 + $0x1], 0 }
   0x4   :  { %10 = vsyncpa [#allocation6], 0 }
   0x5   :  { %12 = vsyncpa [#allocation6 + $0x1], 0 }
   0x6   :  { %13 = vsyncpa [#allocation4], 0 }
   0x7   :  { %15 = vsyncpa [#allocation4 + $0x1], 0  ;;  %s651_s9 = smov 0   ;;  %s653_s10 = smov 0  }
   0x8   :  { %s655_s11 = smov 0   ;;  %s657_s12 = smov 0  }
   0x9   :  { %s659_s13 = smov 0   ;;  %s661_s14 = smov 0  }
   0xa   :  { %s663_s15 = smov 0   ;;  %s665_s16 = smov 0  }
   0xb LB: > { %s372_s17 = sadd.s32 4294967295, %s631_s16   ;;  %s373_s18 = sadd.s32 4294967294, %s631_s16   ;;  %s631_s16 = sphi %s665_s16, %s21_s16   ;;  %s627_s15 = sphi %s663_s15, %s861_s15   ;;  %s623_s14 = sphi %s661_s14, %s860_s14   ;;  %s619_s13 = sphi %s659_s13, %s859_s13   ;;  %s615_s12 = sphi %s657_s12, %s858_s12   ;;  %s611_s11 = sphi %s655_s11, %s857_s11   ;;  %s607_s10 = sphi %s653_s10, %s856_s10   ;;  %s603_s9 = sphi %s651_s9, %s855_s9  }
   0xc   : > { %s30_s19 = sadd.s32 1, %s623_s14  ;;  %s33_s20 = sadd.s32 1, %s627_s15 }
   0xd   : > { %p31_p0 = scmp.ge.s32.totalorder %s30_s19, 2  ;;  %s42_s21 = sadd.s32 1, %s611_s11 }
   0xe   : > { %p49_p1 = scmp.ne.s32.totalorder %s611_s11, %s607_s10  ;;  %p50_p2 = scmp.eq.s32.totalorder %s631_s16, 0 }
   0xf   : > { %s863_s19 = smov (%p31_p0, %s30_s19), 0  ;;  %s865_s20 = smov (!%p31_p0, %s33_s20), %s627_s15 }
  0x10   : > { %s38_s22 = ssub.s32 %s623_s14, %s863_s19  ;;  %p704_p3 = por %p50_p2, %p49_p1 }
  0x11   : > { %p35_p4 = scmp.ge.s32.totalorder %s865_s20, 2  ;;  %p55_p5 = scmp.ne.s32.totalorder %s607_s10, %s603_s9 }
  0x12   : > { %p56_p6 = scmp.eq.s32.totalorder %s372_s17, 0  ;;  %p109_p7 = scmp.eq.s32.totalorder %s372_s17, 3 }
  0x13   : > { %s867_s20 = smov (%p35_p4, %s865_s20), 0  ;;  %p115_p10 = scmp.eq.s32.totalorder %s373_s18, 3 }
  0x14   : > { %p712_p8 = por %p56_p6, %p55_p5  ;;  %p716_p9 = por %p109_p7, %p49_p1 }
  0x15   : > { %s37_s26 = ssub.s32 %s627_s15, %s867_s20  ;;  %p722_p12 = por %p115_p10, %p55_p5 }
  0x16   : > { %s39_s27 = sor.u32 %s38_s22, %s37_s26  ;;  %p405_p13 = scmp.lt.s32.totalorder %s631_s16, 4 }
  0x17   : > { %p40_p11 = scmp.eq.s32.totalorder %s39_s27, 0  ;;  %s728_s29 = sand.u32 1, %s611_s11  }
  0x18   : > { %s376_s3 = sshll.u32 %s728_s29, 2  ;;  %s377_s4 = sshll.u32 %s627_s15, 1 }
  0x19   : > { %s731_s30 = scalar_select %p40_p11, %s611_s11, %s42_s21  }
  0x1a   : > { %s736_s5 = sadd.s32 %s623_s14, %s377_s4  ;;  %s139_s6 = scalar_lea.vmem [#allocation2], %s376_s3 }
  0x1b   : > { %s148_s7 = sshll.u32 %s139_s6, 4  ;;  %s378_s8 = sshll.u32 %s736_s5, 6  ;;  %s149_s7 = int_to_ptr.vmem [resolvable:$true] %s148_s7 }
  0x1c   : > { %s852_s0 = sld [smem:[#allocation11_spill]]  ;;  %p744_p0 = pnand %p405_p13, %p704_p3 }
  0x1d   : > { %p381_p1 = scmp.ge.s32.totalorder %s631_s16, 1  ;;  %p172_p2 = scmp.lt.s32.totalorder %s631_s16, 5 }
  0x1e   : > { %s136_s21 = scalar_lea.sflag [#allocation3], %s728_s29  ;;  %p477_p4 = pneg %p744_p0 }
  0x1f   : > { %s488_s27 = scalar_lea.vmem %s149_s7, 64  ;;  %s633_s3 = smov [#allocation2]  }
  0x20   : > { %p489_p5 = scmp.ne.s32.totalorder %s149_s7, %s488_s27  ;;  %s493_s4 = sshll.u32 %s633_s3, 4  ;;  %s494_s4 = int_to_ptr.vmem [resolvable:$false] %s493_s4 }
  0x21   : > { %s495_s23 = scalar_lea.vmem %s494_s4, 128  ;;  %p496_p3 = scmp.lt.s32.totalorder %s149_s7, %s494_s4 }
  0x22   : > { %s146_s22 = scalar_lea.hbm %s852_s0, %s378_s8  ;;  %p491_p6 = pnand %p489_p5, %p477_p4 }
  0x23   : > { %p497_p10 = scmp.lt.s32.totalorder %s495_s23, %s488_s27 }
  0x24   : > { %p492_p7 = pneg %p491_p6 }
  0x25   : > { %p498_p11 = por %p497_p10, %p496_p3 }
  0x27   : > { %p499_p13 = pnand %p498_p11, %p492_p7 }
  0x29   : > { %502 = shalt.err (!%p499_p13)
}
  0x2a   : > { %397 = dma.hbm_to_vmem [thread:$0]  (!%p744_p0), %s146_s22, 64, %s149_s7, %s136_s21  }
  0x2b   : > { %p762_p5 = pnand %p381_p1, %p172_p2  ;;  %s380_s8 = sshll.u32 %s736_s5, 4 }
  0x2c   : > { %s158_s17 = scalar_lea.vmem [#allocation5], %s728_s29  ;;  %s165_s4 = scalar_lea.hbm %s845_s1, %s380_s8 }
  0x2d   : > { %s167_s18 = sshll.u32 %s158_s17, 4  ;;  %s156_s23 = scalar_lea.sflag [#allocation6], %s728_s29  ;;  %s168_s18 = int_to_ptr.vmem [resolvable:$true] %s167_s18 }
  0x2e   : > { %s516_s0 = scalar_lea.vmem %s168_s18, 16  ;;  %s634_s7 = smov [#allocation5]  }
  0x2f   : > { %p517_p6 = scmp.ne.s32.totalorder %s168_s18, %s516_s0  ;;  %s521_s22 = sshll.u32 %s634_s7, 4  ;;  %s522_s22 = int_to_ptr.vmem [resolvable:$false] %s521_s22 }
  0x30   : > { %s523_s21 = scalar_lea.vmem %s522_s22, 32  ;;  %p524_p1 = scmp.lt.s32.totalorder %s168_s18, %s522_s22 }
  0x31   : > { %p519_p7 = pnand %p517_p6, %p477_p4  ;;  %p525_p2 = scmp.lt.s32.totalorder %s523_s21, %s516_s0 }
  0x33   : > { %p520_p3 = pneg %p519_p7  ;;  %p526_p10 = por %p525_p2, %p524_p1 }
  0x35   : > { %p527_p11 = pnand %p526_p10, %p520_p3 }
  0x37   : > { %530 = shalt.err (!%p527_p11)
}
  0x38   : > { %400 = dma.hbm_to_vmem [thread:$0]  (!%p744_p0), %s165_s4, 16, %s168_s18, %s156_s23  }
  0x39   : > { %176 = sbr.rel (%p762_p5) target bundleno = 143 (0x8f), region = 28  ;;  %s780_s29 = sand.u32 (!%p762_p5), 1, %s607_s10  }
  0x3a   : > { %s382_s5 = sshll.u32 (!%p762_p5), %s780_s29, 2  ;;  %s179_s8 = scalar_lea.sflag (!%p762_p5), [#allocation3], %s780_s29 }
  0x3b   : > { %s182_s17 = scalar_lea.vmem (!%p762_p5), [#allocation2], %s382_s5 }
  0x3e   : > { %590 = dma.done.wait (%p712_p8), %s179_s8, 64  }
  0x3f   : > { %592 = vsyncadd (%p712_p8), %s179_s8, 4294967232  ;;  %s188_s0 = scalar_lea.sflag [#allocation6], %s780_s29  ;;  %s190_s26 = scalar_lea.vmem [#allocation5], %s780_s29 }
  0x40   : > { %594 = dma.done.wait (%p712_p8), %s188_s0, 16  }
  0x41   : > { %596 = vsyncadd (%p712_p8), %s188_s0, 4294967280  ;;  %vm216_vm0 = vcmask 1043456   ;;  %v214_v0 = vld [vmem:[%s182_s17] sm:$0xf]  ;;  %v237_v10 = vlaneseq  ;;  %s384_s24 = sshll.u32 %s619_s13, 1  ;;  %s213_s18 = scalar_lea.vmem [#allocation7], %s780_s29 }
  0x42   : > { %v217_v1 = vsel %vm216_vm0, %v214_v0, -inf  ;;  %v383_v12 = vld [vmem:[%s190_s26] ss:$0 sm:$0xff]  ;;  %s265_s6 = sadd.s32 %s615_s12, %s384_s24  ;;  %s269_s27 = sshll.u32 %s213_s18, 4  ;;  %s270_s27 = int_to_ptr.vmem [resolvable:$true] %s269_s27 }
  0x43   : > { %v218_v2 = vrot.slane %v217_v1, 4  ;;  %v238_v11 = vshrl.u32 %v237_v10, 7  ;;  %s385_s3 = sshll.u32 %s265_s6, 4  ;;  %s255_s22 = scalar_lea.sflag [#allocation4], %s780_s29 }
  0x44   : > { %s267_s7 = scalar_lea.hbm %s846_s2, %s385_s3  ;;  %s531_s21 = scalar_lea.vmem %s270_s27, 16 }
  0x45   : > { %v219_v3 = vmax.f32 %v217_v1, %v218_v2  ;;  %vm243_vm1 = vcmp.eq.s32.totalorder %v238_v11, %v383_v12  ;;  %p532_p8 = scmp.ne.s32.totalorder %s270_s27, %s531_s21  ;;  %s635_s12 = smov [#allocation7]  }
  0x46   : > { %v244_v16 = vsel %vm243_vm1, %v214_v0, 0.0  ;;  %s535_s13 = sshll.u32 %s635_s12, 4  ;;  %s536_s13 = int_to_ptr.vmem [resolvable:$false] %s535_s13 }
  0x47   : > { %v220_v4 = vrot.slane %v219_v3, 2  ;;  %v245_v18 = vsel %vm216_vm0, %v244_v16, 0.0  ;;  %p533_p0 = pnand %p532_p8, %p716_p9  ;;  %s537_s5 = scalar_lea.vmem %s536_s13, 32 }
  0x48   : > { %v246_v21 = vrot.slane %v245_v18, 4  ;;  %p538_p13 = scmp.lt.s32.totalorder %s270_s27, %s536_s13  ;;  %p539_p5 = scmp.lt.s32.totalorder %s537_s5, %s531_s21 }
  0x49   : > { %v221_v5 = vmax.f32 %v219_v3, %v220_v4  ;;  %p534_p4 = pneg %p533_p0 }
  0x4a   : > { %v247_v24 = vadd.f32 %v246_v21, %v245_v18  ;;  %p540_p6 = por %p539_p5, %p538_p13 }
  0x4b   : > { %v222_v6 = vrot.slane %v221_v5, 1 }
  0x4c   : > { %v248_v25 = vrot.slane %v247_v24, 2  ;;  %p541_p7 = pnand %p540_p6, %p534_p4 }
  0x4d   : > { %v223_v7 = vmax.f32 %v221_v5, %v222_v6 }
  0x4e   : > { %v249_v26 = vadd.f32 %v248_v25, %v247_v24 }
  0x4f   : > { %v224_v8 = vsub.f32 %v214_v0, %v223_v7 }
  0x50   : > { %v250_v27 = vrot.slane %v249_v26, 1 }
  0x51   : > { %v225_v9 = vmul.f32 1.442695, %v224_v8 }
  0x52   : > { %v251_v30 = vadd.f32 %v250_v27, %v249_v26 }
  0x53   : > { %471 = vpow2.f32 %v225_v9 }
  0x60   : > { %v472_v13 = vpop.eup %471 }
  0x61   : > { %v227_v14 = vsel %vm216_vm0, %v472_v13, 0.0 }
  0x62   : > { %v228_v15 = vrot.slane %v227_v14, 4 }
  0x64   : > { %v229_v17 = vadd.f32 %v228_v15, %v227_v14 }
  0x66   : > { %v230_v19 = vrot.slane %v229_v17, 2 }
  0x68   : > { %v231_v20 = vadd.f32 %v230_v19, %v229_v17 }
  0x6a   : > { %v232_v22 = vrot.slane %v231_v20, 1 }
  0x6c   : > { %v233_v23 = vadd.f32 %v232_v22, %v231_v20 }
  0x6e   : > { %473 = vlog2.f32 %v233_v23 }
  0x7b   : > { %v474_v28 = vpop.eup %473 }
  0x7c   : > { %v235_v29 = vmul.f32 0.6931472, %v474_v28 }
  0x7e   : > { %v236_v31 = vadd.f32 %v235_v29, %v223_v7 }
  0x80   : > { %v252_v32 = vsub.f32 %v236_v31, %v251_v30 }
  0x82   : > { %253 = vst [vmem:[%s213_s18] sm:$0x1] %v252_v32 }
  0x83   : > { %544 = shalt.err (!%p541_p7)
}
  0x84   : > { %s545_s8 = scalar_lea.hbm %s267_s7, 16  ;;  %s549_s0 = scalar_lea.hbm %s846_s2, 64 }
  0x85   : > { %p546_p3 = scmp.ne.s32.totalorder %s267_s7, %s545_s8  ;;  %p550_p10 = scmp.lt.s32.totalorder %s267_s7, %s846_s2 }
  0x86   : > { %p551_p11 = scmp.lt.s32.totalorder %s549_s0, %s545_s8 }
  0x87   : > { %p547_p1 = pnand %p546_p3, %p716_p9 }
  0x88   : > { %p552_p8 = por %p551_p11, %p550_p10 }
  0x89   : > { %p548_p2 = pneg %p547_p1 }
  0x8b   : > { %p553_p0 = pnand %p552_p8, %p548_p2 }
  0x8d   : > { %556 = shalt.err (!%p553_p0)
}
  0x8e   : > { %392 = dma.vmem_to_hbm [thread:$0]  (%p716_p9), %s270_s27, 16, %s267_s7, %s255_s22  }
  0x8f PF: > { %p406_p4 = scmp.ge.s32.totalorder %s631_s16, 2  ;;  %s281_s6 = sand.u32 1, %s603_s9  }
  0x90   : > { %s282_s18 = scalar_lea.sflag [#allocation4], %s281_s6 }
  0x91   : > { %p402_p13 = pnand %p406_p4, %p722_p12 }
  0x93   : > { %p403_p5 = pneg %p402_p13 }
  0x95   : > { %598 = dma.done.wait (%p403_p5), %s282_s18, 16  }
  0x96   : > { %600 = vsyncadd (%p403_p5), %s282_s18, 4294967280  ;;  %s21_s16 = sadd.s32 1, %s631_s16   ;;  %s855_s9 = smov %s607_s10 }
  0x97   : > { %p18_p6 = scmp.ge.s32.totalorder %s21_s16, 6   ;;  %s856_s10 = smov %s611_s11 }
  0x98   : > { %s857_s11 = smov %s731_s30  ;;  %s858_s12 = smov %s623_s14 }
  0x99   : > { %s859_s13 = smov %s627_s15  ;;  %s860_s14 = smov %s863_s19 }
  0x9a   : > { %s861_s15 = smov %s867_s20  ;;  %20 = sbr.rel (!%p18_p6) target bundleno = 11 (0xb), region = 86 }
  0x9f   :  { %286 = vsyncpa [#allocation3], 1 }
  0xa0   :  { %288 = vsyncpa [#allocation3 + $0x1], 1 }
  0xa1   :  { %289 = vsyncpa [#allocation6], 1 }
  0xa2   :  { %291 = vsyncpa [#allocation6 + $0x1], 1 }
  0xa3   :  { %292 = vsyncpa [#allocation4], 1 }
  0xa4   :  { %294 = vsyncpa [#allocation4 + $0x1], 1 }

</bundles_post_ra>
